<compile_context>
chip_gen: v7x
topology: tpu7x:2x2x1
jax: 0.10.0
libtpu: 0.0.40
codegen_flags: <defaults>
</compile_context>

<pallas_src>
import jax
import jax.numpy as jnp
from jax.experimental import pallas as pl
from jax.experimental.pallas import tpu as pltpu


# ----------------------------------------------------------------------------
# Kernel
# ----------------------------------------------------------------------------
def _propagator_kernel(iv_ref, ov_ref, cur_ref, w_in_ref, w_out_ref,
                       w_cur_ref, w_tcur_ref, b_ref, o_ref):
    """One M-tile of the Propagator forward.

    iv_ref / ov_ref / cur_ref : (TM, D)   in_vec / out_vec / cur_state tiles
    w_in_ref / w_out_ref      : (D, 3D)   columns [r | z | t]
    w_cur_ref                 : (D, 2D)   columns [r | z]
    w_tcur_ref                : (D, D)    t column, applied to (r * cur)
    b_ref                     : (1, 3D)   [br | bz | bt]   (f32)
    o_ref                     : (TM, D)   output tile
    """
    D = cur_ref.shape[-1]
    cdt = w_in_ref.dtype                         # MXU input dtype (f32 or bf16)

    cur = cur_ref[...].astype(jnp.float32)       # keep blend in f32

    # Pre-activations for all 3D output columns, f32-accumulated on the MXU.
    pre = jnp.dot(iv_ref[...].astype(cdt), w_in_ref[...],
                  preferred_element_type=jnp.float32)
    pre += jnp.dot(ov_ref[...].astype(cdt), w_out_ref[...],
                   preferred_element_type=jnp.float32)
    pre += b_ref[...]

    # cur_state only contributes to the r|z columns here; its t-column
    # contribution goes through the reset gate below (no zero-padded block).
    rz = pre[:, 0:2 * D] + jnp.dot(cur_ref[...].astype(cdt), w_cur_ref[...],
                                   preferred_element_type=jnp.float32)

    # sigmoid(x) == 0.5 * (tanh(0.5 x) + 1): stays on the EUP (no VPU divide).
    r = 0.5 * (jnp.tanh(0.5 * rz[:, 0:D]) + 1.0)
    z = 0.5 * (jnp.tanh(0.5 * rz[:, D:2 * D]) + 1.0)

    t_pre = pre[:, 2 * D:3 * D] + jnp.dot(
        (r * cur).astype(cdt), w_tcur_ref[...],
        preferred_element_type=jnp.float32)
    h_hat = jnp.tanh(t_pre)

    o_ref[...] = ((1.0 - z) * cur + z * h_hat).astype(o_ref.dtype)


# ----------------------------------------------------------------------------
# One-time weight preparation (OUTSIDE the per-step hot path)
# ----------------------------------------------------------------------------
def prepare_params(params, compute_dtype=jnp.float32):
    """params follow torch nn.Linear(3D, D) layout: w_* is [D, 3D], b_* is [D].

    Use compute_dtype=jnp.bfloat16 on v6e/v7x for half the weight DMA/VMEM and
    ~2x MXU throughput (f32 accumulation is preserved in-kernel).
    """
    D = params["b_reset"].shape[0]
    wr_t = params["w_reset"].T        # [3D, D]
    wz_t = params["w_update"].T       # [3D, D]
    wt_t = params["w_transform"].T    # [3D, D]

    def rows(w, blk):                 # blk: 0 = in_vec rows, 1 = out_vec, 2 = cur
        return w[blk * D:(blk + 1) * D, :]

    w_in = jnp.concatenate([rows(wr_t, 0), rows(wz_t, 0), rows(wt_t, 0)], axis=1)
    w_out = jnp.concatenate([rows(wr_t, 1), rows(wz_t, 1), rows(wt_t, 1)], axis=1)
    w_cur = jnp.concatenate([rows(wr_t, 2), rows(wz_t, 2)], axis=1)
    w_tcur = rows(wt_t, 2)
    b = jnp.concatenate([params["b_reset"], params["b_update"],
                         params["b_transform"]]).reshape(1, 3 * D)

    return {
        "w_in": w_in.astype(compute_dtype),      # [D, 3D]
        "w_out": w_out.astype(compute_dtype),    # [D, 3D]
        "w_cur": w_cur.astype(compute_dtype),    # [D, 2D]
        "w_tcur": w_tcur.astype(compute_dtype),  # [D, D]
        "b": b.astype(jnp.float32),              # [1, 3D]
    }


# ----------------------------------------------------------------------------
# Wrapper
# ----------------------------------------------------------------------------
def _pick_tile_m(M, tile_m):
    """Full-array block if it fits, else fixed tile_m with a ragged last block.
    Splits a single big block in two so both v7x TensorCores get work."""
    if M <= tile_m:
        if M >= 256 and M % 2 == 0 and (M // 2) % 8 == 0:
            return M // 2
        return M
    return tile_m


def propagator_forward(cur_state, in_vec, out_vec, prepped, *, tile_m=512):
    """cur_state / in_vec / out_vec: [B, N, D].  prepped: prepare_params()."""
    B, N, D = cur_state.shape
    M = B * N
    assert D % 128 == 0, "d_model must be a multiple of 128 (TPU lane width)"

    iv = in_vec.reshape(M, D)
    ov = out_vec.reshape(M, D)
    cs = cur_state.reshape(M, D)

    tm = _pick_tile_m(M, tile_m)
    grid = (pl.cdiv(M, tm),)

    w_dtype = prepped["w_in"].dtype
    w_itemsize = jnp.dtype(w_dtype).itemsize
    a_itemsize = jnp.dtype(cur_state.dtype).itemsize

    # Grid-invariant weight specs: constant index_map -> DMA'd once.  Single-
    # buffer them once the weight footprint matters (D >= 256) to halve
    # resident weight VMEM (critical on v7x's 64 MiB and v5e's 16 MiB scoped).
    single_buffer = D >= 256

    def w_spec(shape):
        if single_buffer:
            return pl.BlockSpec(shape, lambda i: (0, 0),
                                pipeline_mode=pl.Buffered(1))
        return pl.BlockSpec(shape, lambda i: (0, 0))

    act_spec = pl.BlockSpec((tm, D), lambda i: (i, 0))
    out_spec = pl.BlockSpec((tm, D), lambda i: (i, 0))

    in_specs = [
        act_spec, act_spec, act_spec,                   # in_vec, out_vec, cur
        w_spec((D, 3 * D)), w_spec((D, 3 * D)),         # w_in, w_out
        w_spec((D, 2 * D)), w_spec((D, D)),             # w_cur, w_tcur
        w_spec((1, 3 * D)),                             # bias
    ]

    # VMEM budget: raise the scoped limit only when large D actually needs it.
    weight_bytes = 9 * D * D * w_itemsize * (1 if single_buffer else 2)
    act_bytes = 2 * tm * D * 4 * a_itemsize             # dbl-buffered 3 in + 1 out
    vmem_needed = weight_bytes + act_bytes + (3 * D * 4)
    vmem_limit = None
    if vmem_needed > 24 << 20:
        vmem_limit = int(min(100 << 20, vmem_needed * 5 // 4 + (4 << 20)))

    cost = pl.CostEstimate(
        flops=18 * M * D * D + 8 * M * D,
        transcendentals=3 * M * D,
        bytes_accessed=4 * M * D * a_itemsize + 9 * D * D * w_itemsize + 12 * D,
    )

    out = pl.pallas_call(
        _propagator_kernel,
        out_shape=jax.ShapeDtypeStruct((M, D), cur_state.dtype),
        grid_spec=pltpu.PrefetchScalarGridSpec(
            num_scalar_prefetch=0,
            grid=grid,
            in_specs=in_specs,
            out_specs=out_spec,
        ),
        compiler_params=pltpu.CompilerParams(
            dimension_semantics=("parallel",),
            vmem_limit_bytes=vmem_limit),
        cost_estimate=cost,
    )(iv, ov, cs,
      prepped["w_in"], prepped["w_out"], prepped["w_cur"], prepped["w_tcur"],
      prepped["b"])

    return out.reshape(B, N, D)


# ----------------------------------------------------------------------------
# Pure-JAX reference + synthetic params
# ----------------------------------------------------------------------------
def _reference_forward(cur_state, in_vec, out_vec, params):
    """Matches the PyTorch module in eval mode (dropout = identity)."""
    a = jnp.concatenate([in_vec, out_vec, cur_state], axis=2)
    r = jax.nn.sigmoid(a @ params["w_reset"].T + params["b_reset"])
    z = jax.nn.sigmoid(a @ params["w_update"].T + params["b_update"])
    joined = jnp.concatenate([in_vec, out_vec, r * cur_state], axis=2)
    h_hat = jnp.tanh(joined @ params["w_transform"].T + params["b_transform"])
    return (1.0 - z) * cur_state + z * h_hat


def init_params(key, state_dim):
    """Deterministic synthetic parameters (shapes follow nn.Linear(3D, D))."""
    ks = jax.random.split(key, 6)
    bound = 1.0 / jnp.sqrt(3.0 * state_dim)
    shape_w = (state_dim, 3 * state_dim)    # torch Linear weight layout [out, in]
    shape_b = (state_dim,)
    u = lambda k, s: jax.random.uniform(k, s, jnp.float32, -bound, bound)
    return {
        "w_reset": u(ks[0], shape_w), "b_reset": u(ks[1], shape_b),
        "w_update": u(ks[2], shape_w), "b_update": u(ks[3], shape_b),
        "w_transform": u(ks[4], shape_w), "b_transform": u(ks[5], shape_b),
    }


if __name__ == "__main__":
    batch, node_num, d_model = 2, 8, 128      # M = 16 rows, D = 128 lanes

    key = jax.random.PRNGKey(0)
    k_cur, k_in, k_out, k_par = jax.random.split(key, 4)

    cur_state = jax.random.normal(k_cur, (batch, node_num, d_model), jnp.float32)
    in_vec = jax.random.normal(k_in, (batch, node_num, d_model), jnp.float32)
    out_vec = jax.random.normal(k_out, (batch, node_num, d_model), jnp.float32)
    params = init_params(k_par, d_model)

    # One-time weight prep (outside the per-step hot path).
    prepped = prepare_params(params)

    out = propagator_forward(cur_state, in_vec, out_vec, prepped)
    out = jax.block_until_ready(out)

    ref = _reference_forward(cur_state, in_vec, out_vec, params)
    assert out.shape == (batch, node_num, d_model)
    assert jnp.allclose(out, ref, atol=1e-4, rtol=1e-4), "mismatch vs reference"

    print("KERNEL_OK")
</pallas_src>

<mosaic_0001>
module attributes {stable_mosaic.version = 11 : i64} {
  func.func @_propagator_kernel(%arg0: i32, %arg1: memref<16x128xf32, #tpu.memory_space<vmem>>, %arg2: memref<16x128xf32, #tpu.memory_space<vmem>>, %arg3: memref<16x128xf32, #tpu.memory_space<vmem>>, %arg4: memref<128x384xf32, #tpu.memory_space<vmem>>, %arg5: memref<128x384xf32, #tpu.memory_space<vmem>>, %arg6: memref<128x256xf32, #tpu.memory_space<vmem>>, %arg7: memref<128x128xf32, #tpu.memory_space<vmem>>, %arg8: memref<1x384xf32, #tpu.memory_space<vmem>>, %arg9: memref<16x128xf32, #tpu.memory_space<vmem>>) attributes {dimension_semantics = [#tpu.dimension_semantics<parallel>], iteration_bounds = array<i64: 1>, scalar_prefetch = 0 : i64, scratch_operands = 0 : i64, tpu.core_type = #tpu.core_type<tc>, window_params = [{transform_indices = @transform_0, window_bounds = array<i64: 16, 128>}, {transform_indices = @transform_1, window_bounds = array<i64: 16, 128>}, {transform_indices = @transform_2, window_bounds = array<i64: 16, 128>}, {pipeline_mode = #tpu.pipeline_mode<synchronous>, transform_indices = @transform_3, window_bounds = array<i64: 128, 384>}, {pipeline_mode = #tpu.pipeline_mode<synchronous>, transform_indices = @transform_4, window_bounds = array<i64: 128, 384>}, {pipeline_mode = #tpu.pipeline_mode<synchronous>, transform_indices = @transform_5, window_bounds = array<i64: 128, 256>}, {pipeline_mode = #tpu.pipeline_mode<synchronous>, transform_indices = @transform_6, window_bounds = array<i64: 128, 128>}, {pipeline_mode = #tpu.pipeline_mode<synchronous>, transform_indices = @transform_7, window_bounds = array<i64: 1, 384>}, {transform_indices = @transform_8, window_bounds = array<i64: 16, 128>}]} {
    %c0 = arith.constant 0 : index
    %c0_0 = arith.constant 0 : index
    %0 = vector.load %arg3[%c0, %c0_0] : memref<16x128xf32, #tpu.memory_space<vmem>>, vector<16x128xf32>
    %c0_1 = arith.constant 0 : index
    %c0_2 = arith.constant 0 : index
    %1 = vector.load %arg1[%c0_1, %c0_2] : memref<16x128xf32, #tpu.memory_space<vmem>>, vector<16x128xf32>
    %c0_3 = arith.constant 0 : index
    %c0_4 = arith.constant 0 : index
    %2 = vector.load %arg4[%c0_3, %c0_4] : memref<128x384xf32, #tpu.memory_space<vmem>>, vector<128x384xf32>
    %cst = arith.constant dense<0.000000e+00> : vector<16x384xf32>
    %3 = tpu.matmul %1, %2, %cst {dimension_numbers = #tpu.dot_dimension_numbers<[1], [0], [0], [1], [0, 0, 1, 1], [], []>} : vector<16x128xf32>, vector<128x384xf32>, vector<16x384xf32> -> vector<16x384xf32>
    %c0_5 = arith.constant 0 : index
    %c0_6 = arith.constant 0 : index
    %4 = vector.load %arg2[%c0_5, %c0_6] : memref<16x128xf32, #tpu.memory_space<vmem>>, vector<16x128xf32>
    %c0_7 = arith.constant 0 : index
    %c0_8 = arith.constant 0 : index
    %5 = vector.load %arg5[%c0_7, %c0_8] : memref<128x384xf32, #tpu.memory_space<vmem>>, vector<128x384xf32>
    %cst_9 = arith.constant dense<0.000000e+00> : vector<16x384xf32>
    %6 = tpu.matmul %4, %5, %cst_9 {dimension_numbers = #tpu.dot_dimension_numbers<[1], [0], [0], [1], [0, 0, 1, 1], [], []>} : vector<16x128xf32>, vector<128x384xf32>, vector<16x384xf32> -> vector<16x384xf32>
    %7 = arith.addf %3, %6 : vector<16x384xf32>
    %c0_10 = arith.constant 0 : index
    %c0_11 = arith.constant 0 : index
    %8 = vector.load %arg8[%c0_10, %c0_11] : memref<1x384xf32, #tpu.memory_space<vmem>>, vector<1x384xf32>
    %9 = vector.broadcast %8 : vector<1x384xf32> to vector<16x384xf32>
    %10 = arith.addf %7, %9 : vector<16x384xf32>
    %11 = vector.extract_strided_slice %10 {offsets = [0, 0], sizes = [16, 256], strides = [1, 1]} : vector<16x384xf32> to vector<16x256xf32>
    %c0_12 = arith.constant 0 : index
    %c0_13 = arith.constant 0 : index
    %12 = vector.load %arg3[%c0_12, %c0_13] : memref<16x128xf32, #tpu.memory_space<vmem>>, vector<16x128xf32>
    %c0_14 = arith.constant 0 : index
    %c0_15 = arith.constant 0 : index
    %13 = vector.load %arg6[%c0_14, %c0_15] : memref<128x256xf32, #tpu.memory_space<vmem>>, vector<128x256xf32>
    %cst_16 = arith.constant dense<0.000000e+00> : vector<16x256xf32>
    %14 = tpu.matmul %12, %13, %cst_16 {dimension_numbers = #tpu.dot_dimension_numbers<[1], [0], [0], [1], [0, 0, 1, 1], [], []>} : vector<16x128xf32>, vector<128x256xf32>, vector<16x256xf32> -> vector<16x256xf32>
    %15 = arith.addf %11, %14 : vector<16x256xf32>
    %16 = vector.extract_strided_slice %15 {offsets = [0, 0], sizes = [16, 128], strides = [1, 1]} : vector<16x256xf32> to vector<16x128xf32>
    %cst_17 = arith.constant 5.000000e-01 : f32
    %17 = vector.broadcast %cst_17 : f32 to vector<16x128xf32>
    %18 = arith.mulf %17, %16 : vector<16x128xf32>
    %19 = math.tanh %18 : vector<16x128xf32>
    %cst_18 = arith.constant 1.000000e+00 : f32
    %20 = vector.broadcast %cst_18 : f32 to vector<16x128xf32>
    %21 = arith.addf %19, %20 : vector<16x128xf32>
    %cst_19 = arith.constant 5.000000e-01 : f32
    %22 = vector.broadcast %cst_19 : f32 to vector<16x128xf32>
    %23 = arith.mulf %22, %21 : vector<16x128xf32>
    %24 = vector.extract_strided_slice %15 {offsets = [0, 128], sizes = [16, 128], strides = [1, 1]} : vector<16x256xf32> to vector<16x128xf32>
    %cst_20 = arith.constant 5.000000e-01 : f32
    %25 = vector.broadcast %cst_20 : f32 to vector<16x128xf32>
    %26 = arith.mulf %25, %24 : vector<16x128xf32>
    %27 = math.tanh %26 : vector<16x128xf32>
    %cst_21 = arith.constant 1.000000e+00 : f32
    %28 = vector.broadcast %cst_21 : f32 to vector<16x128xf32>
    %29 = arith.addf %27, %28 : vector<16x128xf32>
    %cst_22 = arith.constant 5.000000e-01 : f32
    %30 = vector.broadcast %cst_22 : f32 to vector<16x128xf32>
    %31 = arith.mulf %30, %29 : vector<16x128xf32>
    %32 = vector.extract_strided_slice %10 {offsets = [0, 256], sizes = [16, 128], strides = [1, 1]} : vector<16x384xf32> to vector<16x128xf32>
    %33 = arith.mulf %23, %0 : vector<16x128xf32>
    %c0_23 = arith.constant 0 : index
    %c0_24 = arith.constant 0 : index
    %34 = vector.load %arg7[%c0_23, %c0_24] : memref<128x128xf32, #tpu.memory_space<vmem>>, vector<128x128xf32>
    %cst_25 = arith.constant dense<0.000000e+00> : vector<16x128xf32>
    %35 = tpu.matmul %33, %34, %cst_25 {dimension_numbers = #tpu.dot_dimension_numbers<[1], [0], [0], [1], [0, 0, 1, 1], [], []>} : vector<16x128xf32>, vector<128x128xf32>, vector<16x128xf32> -> vector<16x128xf32>
    %36 = arith.addf %32, %35 : vector<16x128xf32>
    %37 = math.tanh %36 : vector<16x128xf32>
    %cst_26 = arith.constant 1.000000e+00 : f32
    %38 = vector.broadcast %cst_26 : f32 to vector<16x128xf32>
    %39 = arith.subf %38, %31 : vector<16x128xf32>
    %40 = arith.mulf %39, %0 : vector<16x128xf32>
    %41 = arith.mulf %31, %37 : vector<16x128xf32>
    %42 = arith.addf %40, %41 : vector<16x128xf32>
    %c0_27 = arith.constant 0 : index
    %c0_28 = arith.constant 0 : index
    %43 = vector.load %arg9[%c0_27, %c0_28] : memref<16x128xf32, #tpu.memory_space<vmem>>, vector<16x128xf32>
    tpu.vector_store %arg9[%c0_27, %c0_28], %42 {strides = array<i32>} : memref<16x128xf32, #tpu.memory_space<vmem>>, vector<16x128xf32>,
    return
  }
  func.func @transform_0(%arg0: i32) -> (i32, i32) {
    %c0_i32 = arith.constant 0 : i32
    %c0_i32_0 = arith.constant 0 : i32
    return %arg0, %c0_i32 : i32, i32
  }
  func.func @transform_1(%arg0: i32) -> (i32, i32) {
    %c0_i32 = arith.constant 0 : i32
    %c0_i32_0 = arith.constant 0 : i32
    return %arg0, %c0_i32 : i32, i32
  }
  func.func @transform_2(%arg0: i32) -> (i32, i32) {
    %c0_i32 = arith.constant 0 : i32
    %c0_i32_0 = arith.constant 0 : i32
    return %arg0, %c0_i32 : i32, i32
  }
  func.func @transform_3(%arg0: i32) -> (i32, i32) {
    %c0_i32 = arith.constant 0 : i32
    %c0_i32_0 = arith.constant 0 : i32
    %c0_i32_1 = arith.constant 0 : i32
    return %c0_i32, %c0_i32_0 : i32, i32
  }
  func.func @transform_4(%arg0: i32) -> (i32, i32) {
    %c0_i32 = arith.constant 0 : i32
    %c0_i32_0 = arith.constant 0 : i32
    %c0_i32_1 = arith.constant 0 : i32
    return %c0_i32, %c0_i32_0 : i32, i32
  }
  func.func @transform_5(%arg0: i32) -> (i32, i32) {
    %c0_i32 = arith.constant 0 : i32
    %c0_i32_0 = arith.constant 0 : i32
    %c0_i32_1 = arith.constant 0 : i32
    return %c0_i32, %c0_i32_0 : i32, i32
  }
  func.func @transform_6(%arg0: i32) -> (i32, i32) {
    %c0_i32 = arith.constant 0 : i32
    %c0_i32_0 = arith.constant 0 : i32
    %c0_i32_1 = arith.constant 0 : i32
    return %c0_i32, %c0_i32_0 : i32, i32
  }
  func.func @transform_7(%arg0: i32) -> (i32, i32) {
    %c0_i32 = arith.constant 0 : i32
    %c0_i32_0 = arith.constant 0 : i32
    %c0_i32_1 = arith.constant 0 : i32
    return %c0_i32, %c0_i32_0 : i32, i32
  }
  func.func @transform_8(%arg0: i32) -> (i32, i32) {
    %c0_i32 = arith.constant 0 : i32
    %c0_i32_0 = arith.constant 0 : i32
    return %arg0, %c0_i32 : i32, i32
  }
}

</mosaic_0001>

<bundles_post_ra>
// kernel: tpu_custom_call.1
= control target key start
LH: loop header
LB: loop body
LE: loop exit
PB: predicated region body
PF: predicated region fallthrough
CT: control target
= control target key end

     0   :  { %13 = vsyncpa [#allocation3], 0  ;;  %s1603_s0 = inlined_call_operand.hbm [shape: f32[16,128], index: 0, kind: input, shape index: {}]   ;;  %s1604_s1 = inlined_call_operand.hbm [shape: f32[16,128], index: 1, kind: input, shape index: {}]   ;;  %s1605_s2 = inlined_call_operand.hbm [shape: f32[16,128], index: 2, kind: input, shape index: {}]   ;;  %s1606_s3 = inlined_call_operand.hbm [shape: f32[128,384], index: 3, kind: input, shape index: {}]   ;;  %s1607_s4 = inlined_call_operand.hbm [shape: f32[128,384], index: 4, kind: input, shape index: {}]   ;;  %s1608_s5 = inlined_call_operand.hbm [shape: f32[128,256], index: 5, kind: input, shape index: {}]   ;;  %s1609_s6 = inlined_call_operand.hbm [shape: f32[128,128], index: 6, kind: input, shape index: {}]   ;;  %s1610_s7 = inlined_call_operand.vmem [shape: f32[1,384], index: 7, kind: input, shape index: {}]   ;;  %s1611_s8 = inlined_call_operand.hbm [shape: f32[16,128], index: 8, kind: output, shape index: {}]  }
   0x1   :  { %14 = vsyncpa [#allocation6], 0 }
   0x2   :  { %15 = vsyncpa [#allocation9], 0 }
   0x3   :  { %16 = vsyncpa [#allocation12], 0 }
   0x4   :  { %17 = vsyncpa [#allocation4], 0  ;;  %s1392_s27 = smov [#allocation5]   ;;  %s1393_s29 = smov [#allocation8]  }
   0x5   :  { %s35_s28 = sshll.u32 %s1392_s27, 4  ;;  %s59_s30 = sshll.u32 %s1393_s29, 4  ;;  %s36_s28 = int_to_ptr.vmem [resolvable:$true] %s35_s28  ;;  %s1452_s30 = int_to_ptr.vmem [resolvable:$true] %s59_s30 }
   0x6   :  { %s1206_s11 = scalar_lea.hbm %s1604_s1, 256 }
   0x7   :  { %p1207_p0 = scmp.ne.s32.totalorder %s1604_s1, %s1206_s11  ;;  %p1210_p1 = scmp.lt.u32.totalorder %s1206_s11, %s1604_s1 }
   0x9   :  { %p1212_p2 = pnand %p1210_p1, %p1207_p0 }
   0xb   :  { %1215 = shalt.err (!%p1212_p2)
}
   0xc   :  { %s1216_s16 = scalar_lea.vmem %s36_s28, 256  ;;  %p1221_p4 = scmp.lt.s32.totalorder %s36_s28, %s36_s28 }
   0xd   :  { %p1217_p3 = scmp.ne.s32.totalorder %s36_s28, %s1216_s16  ;;  %p1222_p5 = scmp.lt.s32.totalorder %s1216_s16, %s1216_s16 }
   0xf   :  { %p1223_p6 = por %p1222_p5, %p1221_p4 }
  0x11   :  { %p1224_p7 = pnand %p1223_p6, %p1217_p3 }
  0x13   :  { %1227 = shalt.err (!%p1224_p7)
}
  0x14   :  { %s1394_s17 = smov 128   ;;  %s1395_s18 = smov 8  }
  0x15   :  { %41 = dma.hbm_to_vmem [thread:$0]  %s1604_s1, 256, %s36_s28, [#allocation6], %s1394_s17, %s1394_s17, %s1395_s18  }
  0x16   :  { %s1228_s23 = scalar_lea.hbm %s1606_s3, 6144 }
  0x17   :  { %p1229_p8 = scmp.ne.s32.totalorder %s1606_s3, %s1228_s23  ;;  %p1232_p9 = scmp.lt.u32.totalorder %s1228_s23, %s1606_s3 }
  0x19   :  { %p1234_p10 = pnand %p1232_p9, %p1229_p8 }
  0x1b   :  { %1237 = shalt.err (!%p1234_p10)
}
  0x1c   :  { %s1238_s29 = scalar_lea.vmem %s1452_s30, 6144  ;;  %p1243_p12 = scmp.lt.s32.totalorder %s1452_s30, %s1452_s30 }
  0x1d   :  { %p1239_p11 = scmp.ne.s32.totalorder %s1452_s30, %s1238_s29  ;;  %p1244_p13 = scmp.lt.s32.totalorder %s1238_s29, %s1238_s29 }
  0x1f   :  { %p1245_p0 = por %p1244_p13, %p1243_p12 }
  0x21   :  { %p1246_p1 = pnand %p1245_p0, %p1239_p11 }
  0x23   :  { %1249 = shalt.err (!%p1246_p1)
}
  0x24   :  { %s1396_s1 = smov 384   ;;  %s1397_s28 = smov 24  }
  0x25   :  { %65 = dma.hbm_to_vmem [thread:$0]  %s1606_s3, 6144, %s1452_s30, [#allocation9], %s1396_s1, %s1396_s1, %s1397_s28  }
  0x26   :  { %s1398_s11 = smov [#allocation11]   ;;  %s1250_s15 = scalar_lea.hbm %s1608_s5, 4096 }
  0x27   :  { %s83_s12 = sshll.u32 %s1398_s11, 4  ;;  %p1251_p2 = scmp.ne.s32.totalorder %s1608_s5, %s1250_s15  ;;  %s84_s12 = int_to_ptr.vmem [resolvable:$true] %s83_s12 }
  0x28   :  { %p1254_p3 = scmp.lt.u32.totalorder %s1250_s15, %s1608_s5 }
  0x2a   :  { %p1256_p4 = pnand %p1254_p3, %p1251_p2 }
  0x2c   :  { %1259 = shalt.err (!%p1256_p4)
}
  0x2d   :  { %s1260_s22 = scalar_lea.vmem %s84_s12, 4096  ;;  %p1265_p6 = scmp.lt.s32.totalorder %s84_s12, %s84_s12 }
  0x2e   :  { %p1261_p5 = scmp.ne.s32.totalorder %s84_s12, %s1260_s22  ;;  %p1266_p7 = scmp.lt.s32.totalorder %s1260_s22, %s1260_s22 }
  0x30   :  { %p1267_p8 = por %p1266_p7, %p1265_p6 }
  0x32   :  { %p1268_p9 = pnand %p1267_p8, %p1261_p5 }
  0x34   :  { %1271 = shalt.err (!%p1268_p9)
}
  0x35   :  { %s1399_s3 = smov 256   ;;  %s1400_s30 = smov 16  }
  0x36   :  { %89 = dma.hbm_to_vmem [thread:$0]  %s1608_s5, 4096, %s84_s12, [#allocation12], %s1399_s3, %s1399_s3, %s1400_s30  }
  0x37   :  { %s1401_s25 = smov [#allocation2]   ;;  %s1402_s27 = smov [#allocation7]  }
  0x38   :  { %s23_s26 = sshll.u32 %s1401_s25, 4  ;;  %s47_s29 = sshll.u32 %s1402_s27, 4  ;;  %s24_s26 = int_to_ptr.vmem [resolvable:$true] %s23_s26  ;;  %s48_s29 = int_to_ptr.vmem [resolvable:$true] %s47_s29 }
  0x39   :  { %s1272_s11 = scalar_lea.hbm %s1603_s0, 256 }
  0x3a   :  { %p1273_p10 = scmp.ne.s32.totalorder %s1603_s0, %s1272_s11  ;;  %p1276_p11 = scmp.lt.u32.totalorder %s1272_s11, %s1603_s0 }
  0x3c   :  { %p1278_p12 = pnand %p1276_p11, %p1273_p10 }
  0x3e   :  { %1281 = shalt.err (!%p1278_p12)
}
  0x3f   :  { %s1282_s5 = scalar_lea.vmem %s24_s26, 256  ;;  %p1287_p0 = scmp.lt.s32.totalorder %s24_s26, %s24_s26 }
  0x40   :  { %p1283_p13 = scmp.ne.s32.totalorder %s24_s26, %s1282_s5  ;;  %p1288_p1 = scmp.lt.s32.totalorder %s1282_s5, %s1282_s5 }
  0x42   :  { %p1289_p2 = por %p1288_p1, %p1287_p0 }
  0x44   :  { %p1290_p3 = pnand %p1289_p2, %p1283_p13 }
  0x46   :  { %1293 = shalt.err (!%p1290_p3)
}
  0x47   :  { %29 = dma.hbm_to_vmem [thread:$0]  %s1603_s0, 256, %s24_s26, [#allocation3], %s1394_s17, %s1394_s17, %s1395_s18  }
  0x48   :  { %s1294_s22 = scalar_lea.hbm %s1605_s2, 256 }
  0x49   :  { %p1295_p4 = scmp.ne.s32.totalorder %s1605_s2, %s1294_s22  ;;  %p1298_p5 = scmp.lt.u32.totalorder %s1294_s22, %s1605_s2 }
  0x4b   :  { %p1300_p6 = pnand %p1298_p5, %p1295_p4 }
  0x4d   :  { %1303 = shalt.err (!%p1300_p6)
}
  0x4e   :  { %s1304_s25 = scalar_lea.vmem %s48_s29, 256  ;;  %p1309_p8 = scmp.lt.s32.totalorder %s48_s29, %s48_s29 }
  0x4f   :  { %p1305_p7 = scmp.ne.s32.totalorder %s48_s29, %s1304_s25  ;;  %p1310_p9 = scmp.lt.s32.totalorder %s1304_s25, %s1304_s25 }
  0x51   :  { %p1311_p10 = por %p1310_p9, %p1309_p8 }
  0x53   :  { %p1312_p11 = pnand %p1311_p10, %p1305_p7 }
  0x55   :  { %1315 = shalt.err (!%p1312_p11)
}
  0x56   :  { %53 = dma.hbm_to_vmem [thread:$0]  %s1605_s2, 256, %s48_s29, [#allocation6], %s1394_s17, %s1394_s17, %s1395_s18  }
  0x57   :  { %s1403_s27 = smov [#allocation10]   ;;  %s1404_s10 = smov [#allocation13]  }
  0x58   :  { %s71_s9 = sshll.u32 %s1403_s27, 4  ;;  %s95_s11 = sshll.u32 %s1404_s10, 4  ;;  %s72_s9 = int_to_ptr.vmem [resolvable:$true] %s71_s9  ;;  %s96_s11 = int_to_ptr.vmem [resolvable:$true] %s95_s11 }
  0x59   :  { %s1316_s15 = scalar_lea.hbm %s1607_s4, 6144 }
  0x5a   :  { %p1317_p12 = scmp.ne.s32.totalorder %s1607_s4, %s1316_s15  ;;  %p1320_p13 = scmp.lt.u32.totalorder %s1316_s15, %s1607_s4 }
  0x5c   :  { %p1322_p0 = pnand %p1320_p13, %p1317_p12 }
  0x5e   :  { %1325 = shalt.err (!%p1322_p0)
}
  0x5f   :  { %s1326_s2 = scalar_lea.vmem %s72_s9, 6144  ;;  %p1331_p2 = scmp.lt.s32.totalorder %s72_s9, %s72_s9 }
  0x60   :  { %p1327_p1 = scmp.ne.s32.totalorder %s72_s9, %s1326_s2  ;;  %p1332_p3 = scmp.lt.s32.totalorder %s1326_s2, %s1326_s2 }
  0x62   :  { %p1333_p4 = por %p1332_p3, %p1331_p2 }
  0x64   :  { %p1334_p5 = pnand %p1333_p4, %p1327_p1 }
  0x66   :  { %1337 = shalt.err (!%p1334_p5)
}
  0x67   :  { %77 = dma.hbm_to_vmem [thread:$0]  %s1607_s4, 6144, %s72_s9, [#allocation9], %s1396_s1, %s1396_s1, %s1397_s28  }
  0x68   :  { %s1338_s3 = scalar_lea.hbm %s1609_s6, 2048 }
  0x69   :  { %p1339_p6 = scmp.ne.s32.totalorder %s1609_s6, %s1338_s3  ;;  %p1342_p7 = scmp.lt.u32.totalorder %s1338_s3, %s1609_s6 }
  0x6b   :  { %p1344_p8 = pnand %p1342_p7, %p1339_p6 }
  0x6d   :  { %1347 = shalt.err (!%p1344_p8)
}
  0x6e   :  { %s1348_s0 = scalar_lea.vmem %s96_s11, 2048  ;;  %p1353_p10 = scmp.lt.s32.totalorder %s96_s11, %s96_s11 }
  0x6f   :  { %p1349_p9 = scmp.ne.s32.totalorder %s96_s11, %s1348_s0  ;;  %p1354_p11 = scmp.lt.s32.totalorder %s1348_s0, %s1348_s0 }
  0x71   :  { %p1355_p12 = por %p1354_p11, %p1353_p10 }
  0x73   :  { %p1356_p13 = pnand %p1355_p12, %p1349_p9 }
  0x75   :  { %1359 = shalt.err (!%p1356_p13)
}
  0x76   :  { %101 = dma.hbm_to_vmem [thread:$0]  %s1609_s6, 2048, %s96_s11, [#allocation12], %s1394_s17, %s1394_s17, %s1395_s18  }
  0x77   :  { %1382 = dma.done.wait [#allocation3], 256  }
  0x78   :  { %1383 = vsyncadd [#allocation3], 4294967040 }
  0x79   :  { %1384 = dma.done.wait [#allocation6], 512  }
  0x7a   :  { %1385 = vsyncadd [#allocation6], 4294966784 }
  0x7b   :  { %1386 = dma.done.wait [#allocation9], 12288  }
  0x7c   :  { %1387 = vsyncadd [#allocation9], 4294955008 }
  0x7d   :  { %1388 = dma.done.wait [#allocation12], 6144  }
  0x7e   :  { %1389 = vsyncadd [#allocation12], 4294961152  ;;  %v1405_v0 = vmov 0.0   ;;  %v180_v1 = vld [vmem:[#allocation10 + $0x8] sm:$0xff]  ;;  %v183_v2 = vld [vmem:[#allocation10 + $0x20] sm:$0xff] }
  0x7f   :  { %291 = vmatprep.mubr.f32.mxu0 %v1405_v0  ;;  %v179_v3 = vld [vmem:[#allocation10] sm:$0xff]  ;;  %v969_v4 = vpack.c.bf16 %v183_v2, %v180_v1  ;;  %v182_v5 = vld [vmem:[#allocation10 + $0x18] sm:$0xff]  ;;  %v189_v7 = vld [vmem:[#allocation10 + $0x50] sm:$0xff] }
  0x80   :  { %v186_v6 = vld [vmem:[#allocation10 + $0x38] sm:$0xff]  ;;  %v971_v8 = vpack.c.bf16 %v182_v5, %v179_v3  ;;  %v185_v10 = vld [vmem:[#allocation10 + $0x30] sm:$0xff]  ;;  %v188_v11 = vld [vmem:[#allocation10 + $0x48] sm:$0xff] }
  0x81   :  { %v973_v9 = vpack.c.bf16 %v189_v7, %v186_v6  ;;  %v192_v12 = vld [vmem:[#allocation10 + $0x68] sm:$0xff]  ;;  %970 = vmatprep.subr.bf16.mxu0 %v969_v4  ;;  %v195_v13 = vld [vmem:[#allocation10 + $0x80] sm:$0xff]  ;;  %v975_v14 = vpack.c.bf16 %v188_v11, %v185_v10  ;;  %v194_v17 = vld [vmem:[#allocation10 + $0x78] sm:$0xff] }
  0x82   :  { %972 = vmatpush1.bf16.msra.mxu0 %v971_v8  ;;  %v977_v15 = vpack.c.bf16 %v195_v13, %v192_v12  ;;  %v191_v16 = vld [vmem:[#allocation10 + $0x60] sm:$0xff]  ;;  %v198_v18 = vld [vmem:[#allocation10 + $0x98] sm:$0xff]  ;;  %v201_v19 = vld [vmem:[#allocation10 + $0xb0] sm:$0xff] }
  0x83   :  { %974 = vmatprep.subr.bf16.mxu0 %v973_v9  ;;  %v979_v20 = vpack.c.bf16 %v194_v17, %v191_v16  ;;  %v981_v21 = vpack.c.bf16 %v201_v19, %v198_v18  ;;  %v197_v22 = vld [vmem:[#allocation10 + $0x90] sm:$0xff]  ;;  %v200_v23 = vld [vmem:[#allocation10 + $0xa8] sm:$0xff]  ;;  %v207_v25 = vld [vmem:[#allocation10 + $0xe0] sm:$0xff] }
  0x84   :  { %v204_v24 = vld [vmem:[#allocation10 + $0xc8] sm:$0xff]  ;;  %v177_v26 = vld [vmem:[#allocation5] sm:$0xff]  ;;  %v983_v27 = vpack.c.bf16 %v200_v23, %v197_v22  ;;  %v206_v30 = vld [vmem:[#allocation10 + $0xd8] sm:$0xff] }
  0x85   :  { %896 = vmatprep.mubr.f32.mxu1 %v177_v26  ;;  %v985_v28 = vpack.c.bf16 %v207_v25, %v204_v24  ;;  %v203_v29 = vld [vmem:[#allocation10 + $0xc0] sm:$0xff]  ;;  %v210_v31 = vld [vmem:[#allocation10 + $0xf8] sm:$0xff]  ;;  %v213_v32 = vld [vmem:[#allocation10 + $0x110] sm:$0xff] }
  0x86   :  { %976 = vmatpush1.bf16.msra.mxu0 %v975_v14  ;;  %v987_v33 = vpack.c.bf16 %v206_v30, %v203_v29  ;;  %v989_v34 = vpack.c.bf16 %v213_v32, %v210_v31  ;;  %v209_v35 = vld [vmem:[#allocation10 + $0xf0] sm:$0xff]  ;;  %v212_v36 = vld [vmem:[#allocation10 + $0x108] sm:$0xff]  ;;  %v219_v38 = vld [vmem:[#allocation10 + $0x140] sm:$0xff] }
  0x87   :  { %978 = vmatprep.subr.bf16.mxu0 %v977_v15  ;;  %v216_v37 = vld [vmem:[#allocation10 + $0x128] sm:$0xff]  ;;  %v991_v39 = vpack.c.bf16 %v212_v36, %v209_v35  ;;  %v215_v41 = vld [vmem:[#allocation10 + $0x120] sm:$0xff]  ;;  %v218_v42 = vld [vmem:[#allocation10 + $0x138] sm:$0xff] }
  0x88   :  { %v993_v40 = vpack.c.bf16 %v219_v38, %v216_v37  ;;  %v222_v43 = vld [vmem:[#allocation10 + $0x158] sm:$0xff]  ;;  %v225_v44 = vld [vmem:[#allocation10 + $0x170] sm:$0xff]  ;;  %v995_v45 = vpack.c.bf16 %v218_v42, %v215_v41  ;;  %v224_v48 = vld [vmem:[#allocation10 + $0x168] sm:$0xff] }
  0x89   :  { %v997_v46 = vpack.c.bf16 %v225_v44, %v222_v43  ;;  %v221_v47 = vld [vmem:[#allocation10 + $0x150] sm:$0xff]  ;;  %v130_v49 = vld [vmem:[#allocation8 + $0x8] sm:$0xff]  ;;  %v133_v50 = vld [vmem:[#allocation8 + $0x20] sm:$0xff] }
  0x8a   :  { %980 = vmatpush1.bf16.msra.mxu0 %v979_v20  ;;  %v999_v51 = vpack.c.bf16 %v224_v48, %v221_v47  ;;  %v1033_v52 = vpack.c.bf16 %v133_v50, %v130_v49  ;;  %v129_v53 = vld [vmem:[#allocation8] sm:$0xff]  ;;  %v132_v54 = vld [vmem:[#allocation8 + $0x18] sm:$0xff]  ;;  %v139_v56 = vld [vmem:[#allocation8 + $0x50] sm:$0xff] }
  0x8b   :  { %982 = vmatprep.subr.bf16.mxu0 %v981_v21  ;;  %v136_v55 = vld [vmem:[#allocation8 + $0x38] sm:$0xff]  ;;  %v1035_v57 = vpack.c.bf16 %v132_v54, %v129_v53  ;;  %v135_v58 = vld [vmem:[#allocation8 + $0x30] sm:$0xff]  ;;  %v138_v60 = vld [vmem:[#allocation8 + $0x48] sm:$0xff] }
  0x8c   :  { %v1037_v59 = vpack.c.bf16 %v139_v56, %v136_v55  ;;  %v142_v61 = vld [vmem:[#allocation8 + $0x68] sm:$0xff]  ;;  %v145_v62 = vld [vmem:[#allocation8 + $0x80] sm:$0xff]  ;;  %v181_v63 = vld [vmem:[#allocation10 + $0x10] sm:$0xff]  ;;  %v1039_v5 = vpack.c.bf16 %v138_v60, %v135_v58 }
  0x8d   :  { %v184_v1 = vld [vmem:[#allocation10 + $0x28] sm:$0xff]  ;;  %v187_v2 = vld [vmem:[#allocation10 + $0x40] sm:$0xff]  ;;  %v190_v4 = vld [vmem:[#allocation10 + $0x58] sm:$0xff]  ;;  %v1041_v10 = vpack.c.bf16 %v145_v62, %v142_v61 }
  0x8e   :  { %984 = vmatpush1.bf16.msra.mxu0 %v983_v27  ;;  %v1001_v3 = vpack.c.bf16 %v184_v1, %v181_v63  ;;  %v1563_v6 = vld [vmem:[#allocation5 + $0x8] sm:$0xff]  ;;  %v1005_v7 = vpack.c.bf16 %v190_v4, %v187_v2  ;;  %v193_v8 = vld [vmem:[#allocation10 + $0x70] sm:$0xff]  ;;  %v141_v11 = vld [vmem:[#allocation8 + $0x60] sm:$0xff] }
  0x8f   :  { %986 = vmatprep.subr.bf16.mxu0 %v985_v28  ;;  %v196_v9 = vld [vmem:[#allocation10 + $0x88] sm:$0xff]  ;;  %v144_v12 = vld [vmem:[#allocation8 + $0x78] sm:$0xff]  ;;  %v151_v14 = vld [vmem:[#allocation8 + $0xb0] sm:$0xff] }
  0x90   :  { %1002 = vmatprep.subr.bf16.mxu1 %v1001_v3  ;;  %v148_v13 = vld [vmem:[#allocation8 + $0x98] sm:$0xff]  ;;  %v1009_v15 = vpack.c.bf16 %v196_v9, %v193_v8  ;;  %v1043_v16 = vpack.c.bf16 %v144_v12, %v141_v11  ;;  %v199_v17 = vld [vmem:[#allocation10 + $0xa0] sm:$0xff]  ;;  %v147_v20 = vld [vmem:[#allocation8 + $0x90] sm:$0xff] }
  0x91   :  { %1004 = vmatpush3.bf16.msra.mxu1 %v1001_v3  ;;  %v202_v18 = vld [vmem:[#allocation10 + $0xb8] sm:$0xff]  ;;  %v1045_v19 = vpack.c.bf16 %v151_v14, %v148_v13  ;;  %v150_v21 = vld [vmem:[#allocation8 + $0xa8] sm:$0xff]  ;;  %v157_v23 = vld [vmem:[#allocation8 + $0xe0] sm:$0xff] }
  0x92   :  { %988 = vmatpush1.bf16.msra.mxu0 %v987_v33  ;;  %1006 = vmatprep.subr.bf16.mxu1 %v1005_v7  ;;  %v154_v22 = vld [vmem:[#allocation8 + $0xc8] sm:$0xff]  ;;  %v1013_v24 = vpack.c.bf16 %v202_v18, %v199_v17  ;;  %v1047_v25 = vpack.c.bf16 %v150_v21, %v147_v20  ;;  %v153_v29 = vld [vmem:[#allocation8 + $0xc0] sm:$0xff]  ;;  %v156_v30 = vld [vmem:[#allocation8 + $0xd8] sm:$0xff] }
  0x93   :  { %990 = vmatprep.subr.bf16.mxu0 %v989_v34  ;;  %v208_v27 = vld [vmem:[#allocation10 + $0xe8] sm:$0xff]  ;;  %v1049_v28 = vpack.c.bf16 %v157_v23, %v154_v22  ;;  %v160_v31 = vld [vmem:[#allocation8 + $0xf8] sm:$0xff]  ;;  %v163_v32 = vld [vmem:[#allocation8 + $0x110] sm:$0xff]  ;;  %v1051_v34 = vpack.c.bf16 %v156_v30, %v153_v29 }
  0x94   :  { %v211_v35 = vld [vmem:[#allocation10 + $0x100] sm:$0xff]  ;;  %v214_v36 = vld [vmem:[#allocation10 + $0x118] sm:$0xff]  ;;  %v1053_v37 = vpack.c.bf16 %v163_v32, %v160_v31  ;;  %v159_v38 = vld [vmem:[#allocation8 + $0xf0] sm:$0xff] }
  0x95   :  { %1008 = vmatpush3.bf16.msra.mxu1 %v1005_v7  ;;  %v169_v41 = vld [vmem:[#allocation8 + $0x140] sm:$0xff]  ;;  %v1021_v42 = vpack.c.bf16 %v214_v36, %v211_v35  ;;  %v217_v44 = vld [vmem:[#allocation10 + $0x130] sm:$0xff]  ;;  %v168_v48 = vld [vmem:[#allocation8 + $0x138] sm:$0xff] }
  0x96   :  { %992 = vmatpush1.bf16.msra.mxu0 %v991_v39  ;;  %1010 = vmatprep.subr.bf16.mxu1 %v1009_v15  ;;  %v162_v39 = vld [vmem:[#allocation8 + $0x108] sm:$0xff]  ;;  %v165_v47 = vld [vmem:[#allocation8 + $0x120] sm:$0xff]  ;;  %v172_v49 = vld [vmem:[#allocation8 + $0x158] sm:$0xff] }
  0x97   :  { %994 = vmatprep.subr.bf16.mxu0 %v993_v40  ;;  %v166_v40 = vld [vmem:[#allocation8 + $0x128] sm:$0xff]  ;;  %v1055_v43 = vpack.c.bf16 %v162_v39, %v159_v38  ;;  %v175_v50 = vld [vmem:[#allocation8 + $0x170] sm:$0xff]  ;;  %v223_v53 = vld [vmem:[#allocation10 + $0x160] sm:$0xff] }
  0x98   :  { %v226_v54 = vld [vmem:[#allocation10 + $0x178] sm:$0xff]  ;;  %v1061_v55 = vpack.c.bf16 %v175_v50, %v172_v49  ;;  %v171_v56 = vld [vmem:[#allocation8 + $0x150] sm:$0xff]  ;;  %v555_v58 = vld [vmem:[#allocation11 + $0x8] sm:$0xff] }
  0x99   :  { %1012 = vmatpush3.bf16.msra.mxu1 %v1009_v15  ;;  %v1029_v60 = vpack.c.bf16 %v226_v54, %v223_v53  ;;  %v131_v62 = vld [vmem:[#allocation8 + $0x10] sm:$0xff]  ;;  %v134_v63 = vld [vmem:[#allocation8 + $0x28] sm:$0xff]  ;;  %v554_v2 = vld [vmem:[#allocation11] sm:$0xff] }
  0x9a   :  { %996 = vmatpush1.bf16.msra.mxu0 %v995_v45  ;;  %1014 = vmatprep.subr.bf16.mxu1 %v1013_v24  ;;  %v220_v45 = vld [vmem:[#allocation10 + $0x148] sm:$0xff]  ;;  %v556_v3 = vld [vmem:[#allocation11 + $0x10] sm:$0xff]  ;;  %v1065_v7 = vpack.c.bf16 %v134_v63, %v131_v62  ;;  %v140_v11 = vld [vmem:[#allocation8 + $0x58] sm:$0xff] }
  0x9b   :  { %998 = vmatprep.subr.bf16.mxu0 %v997_v46  ;;  %v1057_v46 = vpack.c.bf16 %v169_v41, %v166_v40  ;;  %v559_v4 = vld [vmem:[#allocation11 + $0x28] sm:$0xff]  ;;  %v127_v8 = vld [vmem:[#allocation2] sm:$0xff]  ;;  %v1099_v9 = vpack.c.bf16 %v556_v3, %v554_v2  ;;  %v558_v13 = vld [vmem:[#allocation11 + $0x20] sm:$0xff] }
  0x9c   :  { %v560_v14 = vld [vmem:[#allocation11 + $0x30] sm:$0xff]  ;;  %v563_v15 = vld [vmem:[#allocation11 + $0x48] sm:$0xff]  ;;  %v562_v23 = vld [vmem:[#allocation11 + $0x40] sm:$0xff] }
  0x9d   :  { %1016 = vmatpush3.bf16.msra.mxu1 %v1013_v24  ;;  %v1103_v18 = vpack.c.bf16 %v560_v14, %v558_v13  ;;  %v143_v20 = vld [vmem:[#allocation8 + $0x70] sm:$0xff]  ;;  %v146_v21 = vld [vmem:[#allocation8 + $0x88] sm:$0xff]  ;;  %v149_v29 = vld [vmem:[#allocation8 + $0xa0] sm:$0xff] }
  0x9e   :  { %1000 = vmatpush1.bf16.msra.mxu0 %v999_v51  ;;  %v1025_v51 = vpack.c.bf16 %v220_v45, %v217_v44  ;;  %v564_v24 = vld [vmem:[#allocation11 + $0x50] sm:$0xff]  ;;  %v152_v30 = vld [vmem:[#allocation8 + $0xb8] sm:$0xff]  ;;  %v566_v32 = vld [vmem:[#allocation11 + $0x60] sm:$0xff] }
  0x9f   :  { %1034 = vmatprep.subr.bf16.mxu0 %v1033_v52  ;;  %v1059_v52 = vpack.c.bf16 %v168_v48, %v165_v47  ;;  %v1077_v35 = vpack.c.bf16 %v152_v30, %v149_v29  ;;  %v158_v38 = vld [vmem:[#allocation8 + $0xe8] sm:$0xff]  ;;  %v570_v40 = vld [vmem:[#allocation11 + $0x80] sm:$0xff]  ;;  %v572_v41 = vld [vmem:[#allocation11 + $0x90] sm:$0xff] }
  0xa0   :  { %v1115_v45 = vpack.c.bf16 %v572_v41, %v570_v40  ;;  %v164_v47 = vld [vmem:[#allocation8 + $0x118] sm:$0xff]  ;;  %v574_v49 = vld [vmem:[#allocation11 + $0xa0] sm:$0xff]  ;;  %v576_v50 = vld [vmem:[#allocation11 + $0xb0] sm:$0xff] }
  0xa1   :  { %292 = vmatmul.mubr.f32.vlgmr.msra.gmra.mrb[0].mxu0 %v177_v26  ;;  %v205_v26 = vld [vmem:[#allocation10 + $0xd0] sm:$0xff]  ;;  %v1119_v54 = vpack.c.bf16 %v576_v50, %v574_v49  ;;  %v176_v2 = vld [vmem:[#allocation8 + $0x178] sm:$0xff]  ;;  %v698_v29 = vld [vmem:[#allocation13 + $0x68] sm:$0xff] }
  0xa2   :  { %1036 = vmatpush1.bf16.msra.mxu0 %v1035_v57  ;;  %297 = vmatprep.mubr.f32.mxu0 %v1405_v0  ;;  %v1017_v33 = vpack.c.bf16 %v208_v27, %v205_v26  ;;  %v174_v57 = vld [vmem:[#allocation8 + $0x168] sm:$0xff]  ;;  %v569_v26 = vld [vmem:[#allocation11 + $0x78] sm:$0xff]  ;;  %v1073_v27 = vpack.c.bf16 %v146_v21, %v143_v20  ;;  %v687_v13 = vld [vmem:[#allocation13 + $0x10] sm:$0xff] }
  0xa3   :  { %1038 = vmatprep.subr.bf16.mxu0 %v1037_v59  ;;  %v557_v59 = vld [vmem:[#allocation11 + $0x18] sm:$0xff]  ;;  %v1063_v61 = vpack.c.bf16 %v174_v57, %v171_v56  ;;  %v170_v56 = vld [vmem:[#allocation8 + $0x148] sm:$0xff]  ;;  %v691_v21 = vld [vmem:[#allocation13 + $0x30] sm:$0xff] }
  0xa4   :  { %1018 = vmatprep.subr.bf16.mxu1 %v1017_v33  ;;  %v1097_v1 = vpack.c.bf16 %v557_v59, %v555_v58  ;;  %v578_v58 = vld [vmem:[#allocation11 + $0xc0] sm:$0xff]  ;;  %v580_v59 = vld [vmem:[#allocation11 + $0xd0] sm:$0xff]  ;;  %v688_v14 = vld [vmem:[#allocation13 + $0x18] sm:$0xff] }
  0xa5   :  { %298 = vmatmul.mubr.f32.gmra.mrb[2].mxu0 %v1563_v6  ;;  %1020 = vmatpush3.bf16.msra.mxu1 %v1017_v33  ;;  %v568_v33 = vld [vmem:[#allocation11 + $0x70] sm:$0xff]  ;;  %v1123_v63 = vpack.c.bf16 %v580_v59, %v578_v58 }
  0xa6   :  { %1040 = vmatpush1.bf16.msra.mxu0 %v1039_v5  ;;  %443 = vmatprep.mubr.f32.mxu0 %v1405_v0  ;;  %v561_v5 = vld [vmem:[#allocation11 + $0x38] sm:$0xff]  ;;  %v1111_v36 = vpack.c.bf16 %v568_v33, %v566_v32 }
  0xa7   :  { %1042 = vmatprep.subr.bf16.mxu0 %v1041_v10  ;;  %1022 = vmatprep.subr.bf16.mxu1 %v1021_v42  ;;  %v137_v10 = vld [vmem:[#allocation8 + $0x40] sm:$0xff]  ;;  %v1101_v12 = vpack.c.bf16 %v561_v5, %v559_v4  ;;  %v584_v5 = vld [vmem:[#allocation11 + $0xf0] sm:$0xff]  ;;  %v700_v32 = vld [vmem:[#allocation13 + $0x78] sm:$0xff] }
  0xa8   :  { %v1069_v17 = vpack.c.bf16 %v140_v11, %v137_v10  ;;  %v582_v4 = vld [vmem:[#allocation11 + $0xe0] sm:$0xff]  ;;  %v686_v10 = vld [vmem:[#allocation13 + $0x8] sm:$0xff] }
  0xa9   :  { %1024 = vmatpush3.bf16.msra.mxu1 %v1021_v42  ;;  %v575_v42 = vld [vmem:[#allocation11 + $0xa8] sm:$0xff] }
  0xaa   :  { %1044 = vmatpush1.bf16.msra.mxu0 %v1043_v16  ;;  %1026 = vmatprep.subr.bf16.mxu1 %v1025_v51  ;;  %v565_v16 = vld [vmem:[#allocation11 + $0x58] sm:$0xff] }
  0xab   :  { %1046 = vmatprep.subr.bf16.mxu0 %v1045_v19  ;;  %v1568_v19 = vld [vmem:[#allocation2 + $0x8] sm:$0xff]  ;;  %v1105_v22 = vpack.c.bf16 %v565_v16, %v563_v15  ;;  %v1133_v15 = vpack.c.bf16 %v688_v14, %v687_v13 }
  0xac   :  { %v1577_v16 = vld [vmem:[#allocation7 + $0x8] sm:$0xff] }
  0xad   :  { %1028 = vmatpush3.bf16.msra.mxu1 %v1025_v51  ;;  %v579_v51 = vld [vmem:[#allocation11 + $0xc8] sm:$0xff] }
  0xae   :  { %1048 = vmatpush1.bf16.msra.mxu0 %v1047_v25  ;;  %1030 = vmatprep.subr.bf16.mxu1 %v1029_v60  ;;  %v567_v25 = vld [vmem:[#allocation11 + $0x68] sm:$0xff] }
  0xaf   :  { %1050 = vmatprep.subr.bf16.mxu0 %v1049_v28  ;;  %v1107_v28 = vpack.c.bf16 %v564_v24, %v562_v23  ;;  %v1109_v31 = vpack.c.bf16 %v569_v26, %v567_v25  ;;  %v694_v24 = vld [vmem:[#allocation13 + $0x48] sm:$0xff]  ;;  %v696_v26 = vld [vmem:[#allocation13 + $0x58] sm:$0xff] }
  0xb1   :  { %1032 = vmatpush3.bf16.msra.mxu1 %v1029_v60  ;;  %v583_v60 = vld [vmem:[#allocation11 + $0xe8] sm:$0xff] }
  0xb2   :  { %1052 = vmatpush1.bf16.msra.mxu0 %v1051_v34  ;;  %1066 = vmatprep.subr.bf16.mxu1 %v1065_v7  ;;  %v571_v34 = vld [vmem:[#allocation11 + $0x88] sm:$0xff] }
  0xb3   :  { %1054 = vmatprep.subr.bf16.mxu0 %v1053_v37  ;;  %v155_v37 = vld [vmem:[#allocation8 + $0xd0] sm:$0xff] }
  0xb4   :  { %897 = vmatmul.mubr.f32.vlgmr.msra.gmra.mrb[0].mxu1 %v1563_v6  ;;  %v573_v6 = vld [vmem:[#allocation11 + $0x98] sm:$0xff]  ;;  %v1081_v44 = vpack.c.bf16 %v158_v38, %v155_v37 }
  0xb5   :  { %1068 = vmatpush3.bf16.msra.mxu1 %v1065_v7  ;;  %931 = vmatprep.mubr.f32.mxu1 %v127_v8  ;;  %v1113_v39 = vpack.c.bf16 %v573_v6, %v571_v34  ;;  %v533_v34 = vlaneseq }
  0xb6   :  { %1056 = vmatpush1.bf16.msra.mxu0 %v1055_v43  ;;  %1070 = vmatprep.subr.bf16.mxu1 %v1069_v17  ;;  %v577_v43 = vld [vmem:[#allocation11 + $0xb8] sm:$0xff] }
  0xb7   :  { %1058 = vmatprep.subr.bf16.mxu0 %v1057_v46  ;;  %v161_v46 = vld [vmem:[#allocation8 + $0x100] sm:$0xff]  ;;  %v1117_v48 = vpack.c.bf16 %v577_v43, %v575_v42  ;;  %v534_v6 = vshrl.u32 %v533_v34, 7 }
  0xb8   :  { %v1085_v53 = vpack.c.bf16 %v164_v47, %v161_v46 }
  0xb9   :  { %1072 = vmatpush3.bf16.msra.mxu1 %v1069_v17  ;;  %v689_v17 = vld [vmem:[#allocation13 + $0x20] sm:$0xff] }
  0xba   :  { %1060 = vmatpush1.bf16.msra.mxu0 %v1059_v52  ;;  %1074 = vmatprep.subr.bf16.mxu1 %v1073_v27  ;;  %v581_v52 = vld [vmem:[#allocation11 + $0xd8] sm:$0xff] }
  0xbb   :  { %1062 = vmatprep.subr.bf16.mxu0 %v1061_v55  ;;  %v167_v55 = vld [vmem:[#allocation8 + $0x130] sm:$0xff]  ;;  %v1121_v57 = vpack.c.bf16 %v581_v52, %v579_v51 }
  0xbc   :  { %v1089_v62 = vpack.c.bf16 %v170_v56, %v167_v55 }
  0xbd   :  { %1076 = vmatpush3.bf16.msra.mxu1 %v1073_v27 }
  0xbe   :  { %1064 = vmatpush1.bf16.msra.mxu0 %v1063_v61  ;;  %1078 = vmatprep.subr.bf16.mxu1 %v1077_v35  ;;  %v585_v61 = vld [vmem:[#allocation11 + $0xf8] sm:$0xff] }
  0xbf   :  { %1098 = vmatprep.subr.bf16.mxu0 %v1097_v1  ;;  %v173_v1 = vld [vmem:[#allocation8 + $0x160] sm:$0xff]  ;;  %v1125_v3 = vpack.c.bf16 %v585_v61, %v583_v60  ;;  %v543_v60 = vsub.s32 2, %v534_v6 }
  0xc0   :  { %v1093_v7 = vpack.c.bf16 %v176_v2, %v173_v1 }
  0xc1   :  { %444 = vmatmul.mubr.f32.vlgmr.msra.gmra.mrb[0].mxu0 %v127_v8  ;;  %1080 = vmatpush3.bf16.msra.mxu1 %v1077_v35  ;;  %v1127_v8 = vpack.c.bf16 %v584_v5, %v582_v4  ;;  %v535_v35 = vsub.s32 0, %v534_v6 }
  0xc2   :  { %1100 = vmatpush1.bf16.msra.mxu0 %v1099_v9  ;;  %449 = vmatprep.mubr.f32.mxu0 %v1405_v0  ;;  %v685_v9 = vld [vmem:[#allocation13] sm:$0xff] }
  0xc3   :  { %1102 = vmatprep.subr.bf16.mxu0 %v1101_v12  ;;  %1082 = vmatprep.subr.bf16.mxu1 %v1081_v44  ;;  %v1129_v11 = vpack.c.bf16 %v686_v10, %v685_v9  ;;  %v1573_v12 = vld [vmem:[#allocation7] sm:$0xff] }
  0xc5   :  { %450 = vmatmul.mubr.f32.gmra.mrb[2].mxu0 %v1568_v19  ;;  %1084 = vmatpush3.bf16.msra.mxu1 %v1081_v44 }
  0xc6   :  { %1104 = vmatpush1.bf16.msra.mxu0 %v1103_v18  ;;  %650 = vmatprep.mubr.f32.mxu0 %v1405_v0  ;;  %v690_v18 = vld [vmem:[#allocation13 + $0x28] sm:$0xff] }
  0xc7   :  { %1106 = vmatprep.subr.bf16.mxu0 %v1105_v22  ;;  %1086 = vmatprep.subr.bf16.mxu1 %v1085_v53  ;;  %v1137_v20 = vpack.c.bf16 %v690_v18, %v689_v17  ;;  %v692_v22 = vld [vmem:[#allocation13 + $0x38] sm:$0xff] }
  0xc8   :  { %v1141_v23 = vpack.c.bf16 %v692_v22, %v691_v21 }
  0xc9   :  { %1088 = vmatpush3.bf16.msra.mxu1 %v1085_v53 }
  0xca   :  { %1108 = vmatpush1.bf16.msra.mxu0 %v1107_v28  ;;  %1090 = vmatprep.subr.bf16.mxu1 %v1089_v62  ;;  %v697_v28 = vld [vmem:[#allocation13 + $0x60] sm:$0xff] }
  0xcb   :  { %1110 = vmatprep.subr.bf16.mxu0 %v1109_v31  ;;  %v1153_v30 = vpack.c.bf16 %v698_v29, %v697_v28  ;;  %v699_v31 = vld [vmem:[#allocation13 + $0x70] sm:$0xff] }
  0xcc   :  { %v1157_v33 = vpack.c.bf16 %v700_v32, %v699_v31 }
  0xcd   :  { %1092 = vmatpush3.bf16.msra.mxu1 %v1089_v62 }
  0xce   :  { %1112 = vmatpush1.bf16.msra.mxu0 %v1111_v36  ;;  %1094 = vmatprep.subr.bf16.mxu1 %v1093_v7  ;;  %v531_v36 = vld [vmem:[%s1610_s7] sm:$0x7]  ;;  %s1406_s7 = smov [#allocation14]  }
  0xcf   :  { %1114 = vmatprep.subr.bf16.mxu0 %v1113_v39  ;;  %v536_v37 = vrot.slane %v531_v36, %v535_v35  ;;  %v544_v61 = vrot.slane %v531_v36, %v543_v60  ;;  %s795_s26 = sshll.u32 %s1406_s7, 4  ;;  %s796_s26 = int_to_ptr.vmem [resolvable:$true] %s795_s26 }
  0xd0   :  { %s1360_s27 = scalar_lea.vmem %s796_s26, 256  ;;  %p1365_p1 = scmp.lt.s32.totalorder %s796_s26, %s796_s26 }
  0xd1   :  { %1096 = vmatpush3.bf16.msra.mxu1 %v1093_v7  ;;  %p1361_p0 = scmp.ne.s32.totalorder %s796_s26, %s1360_s27  ;;  %p1366_p2 = scmp.lt.s32.totalorder %s1360_s27, %s1360_s27 }
  0xd2   :  { %1116 = vmatpush1.bf16.msra.mxu0 %v1115_v45  ;;  %1130 = vmatprep.subr.bf16.mxu1 %v1129_v11 }
  0xd3   :  { %1118 = vmatprep.subr.bf16.mxu0 %v1117_v48  ;;  %p1367_p3 = por %p1366_p2, %p1365_p1 }
  0xd4   :  { %932 = vmatmul.mubr.f32.vlgmr.msra.gmra.mrb[0].mxu1 %v1568_v19  ;;  %v695_v19 = vld [vmem:[#allocation13 + $0x50] sm:$0xff] }
  0xd5   :  { %1132 = vmatpush3.bf16.msra.mxu1 %v1129_v11  ;;  %v1149_v27 = vpack.c.bf16 %v696_v26, %v695_v19  ;;  %p1368_p4 = pnand %p1367_p3, %p1361_p0 }
  0xd6   :  { %1120 = vmatpush1.bf16.msra.mxu0 %v1119_v54  ;;  %1134 = vmatprep.subr.bf16.mxu1 %v1133_v15  ;;  %v539_v54 = vsub.s32 1, %v534_v6 }
  0xd7   :  { %1122 = vmatprep.subr.bf16.mxu0 %v1121_v57 }
  0xd8   :  { %v540_v55 = vrot.slane %v531_v36, %v539_v54 }
  0xd9   :  { %1136 = vmatpush3.bf16.msra.mxu1 %v1133_v15 }
  0xda   :  { %1124 = vmatpush1.bf16.msra.mxu0 %v1123_v63  ;;  %1138 = vmatprep.subr.bf16.mxu1 %v1137_v20 }
  0xdb   :  { %1126 = vmatprep.subr.bf16.mxu0 %v1125_v3 }
  0xdd   :  { %1140 = vmatpush3.bf16.msra.mxu1 %v1137_v20 }
  0xde   :  { %1128 = vmatpush1.bf16.msra.mxu0 %v1127_v8  ;;  %1142 = vmatprep.subr.bf16.mxu1 %v1141_v23 }
  0xe1   :  { %651 = vmatmul.mubr.f32.vlgmr.msra.gmra.mrb[0].mxu0 %v1573_v12  ;;  %1144 = vmatpush3.bf16.msra.mxu1 %v1141_v23 }
  0xe2   :  { %656 = vmatprep.mubr.f32.mxu0 %v1405_v0  ;;  %v693_v0 = vld [vmem:[#allocation13 + $0x40] sm:$0xff] }
  0xe3   :  { %v1145_v25 = vpack.c.bf16 %v694_v24, %v693_v0 }
  0xe5   :  { %657 = vmatmul.mubr.f32.gmra.mrb[2].mxu0 %v1577_v16  ;;  %1146 = vmatprep.subr.bf16.mxu1 %v1145_v25 }
  0xe6   :  { %1148 = vmatpush3.bf16.msra.mxu1 %v1145_v25 }
  0xe7   :  { %1150 = vmatprep.subr.bf16.mxu1 %v1149_v27 }
  0xea   :  { %1152 = vmatpush3.bf16.msra.mxu1 %v1149_v27 }
  0xeb   :  { %1154 = vmatprep.subr.bf16.mxu1 %v1153_v30 }
  0xee   :  { %1156 = vmatpush3.bf16.msra.mxu1 %v1153_v30 }
  0xef   :  { %1158 = vmatprep.subr.bf16.mxu1 %v1157_v33 }
  0xf2   :  { %1160 = vmatpush3.bf16.msra.mxu1 %v1157_v33 }
 0x1b4   :  { %v652_v38 = vpop.f32.mrb[0].mxu0 }
 0x1b5   :  { %v1161_v39 = vadd.f32 %v652_v38, %v536_v37  ;;  %v654_v40 = vpop.f32.mrb[1].mxu0 }
 0x1b6   :  { %v1162_v57 = vadd.f32 %v654_v40, %v540_v55 }
 0x1b7   :  { %v667_v41 = vmul.f32 0.5, %v1161_v39 }
 0x1b8   :  { %v658_v42 = vpop.f32.mrb[2].mxu0  ;;  %v675_v59 = vmul.f32 0.5, %v1162_v57 }
 0x1b9   :  { %1194 = vtanh.f32 %v667_v41  ;;  %v1163_v43 = vadd.f32 %v658_v42, %v536_v37  ;;  %v660_v44 = vpop.f32.mrb[3].mxu0 }
 0x1ba   :  { %v1164_v56 = vadd.f32 %v660_v44, %v540_v55 }
 0x1bb   :  { %v668_v45 = vmul.f32 0.5, %v1163_v43 }
 0x1bc   :  { %v676_v58 = vmul.f32 0.5, %v1164_v56 }
 0x1bd   :  { %1196 = vtanh.f32 %v668_v45 }
 0x1be   :  { %1198 = vtanh.f32 %v676_v58 }
 0x1bf   :  { %1200 = vtanh.f32 %v675_v59 }
 0x1c3   :  { %v1195_v46 = vpop.eup %1194 }
 0x1c4   :  { %v671_v47 = vadd.f32 1.0, %v1195_v46 }
 0x1c6   :  { %v673_v48 = vmul.f32 0.5, %v671_v47 }
 0x1c7   :  { %v1197_v49 = vpop.eup %1196 }
 0x1c8   :  { %v672_v50 = vadd.f32 1.0, %v1197_v49  ;;  %v683_v51 = vmul.f32 %v673_v48, %v1573_v12  ;;  %v1199_v62 = vpop.eup %1198 }
 0x1c9   :  { %v1201_v63 = vpop.eup %1200  ;;  %v680_v4 = vadd.f32 1.0, %v1199_v62 }
 0x1ca   :  { %v674_v52 = vmul.f32 0.5, %v672_v50  ;;  %966 = vmatprep.mubr.f32.mxu1 %v683_v51  ;;  %v679_v7 = vadd.f32 1.0, %v1201_v63 }
 0x1cb   :  { %v682_v8 = vmul.f32 0.5, %v680_v4 }
 0x1cc   :  { %v684_v53 = vmul.f32 %v674_v52, %v1577_v16  ;;  %v681_v9 = vmul.f32 0.5, %v679_v7 }
 0x1cd   :  { %v781_v10 = vsub.f32 1.0, %v682_v8 }
 0x1ce   :  { %967 = vmatmul.mubr.f32.vlgmr.msra.gmra.mrb[0].mxu1 %v684_v53  ;;  %v780_v11 = vsub.f32 1.0, %v681_v9 }
 0x1cf   :  { %v783_v15 = vmul.f32 %v781_v10, %v1577_v16 }
 0x1d0   :  { %v782_v18 = vmul.f32 %v780_v11, %v1573_v12 }
 0x2a1   :  { %v968_v1 = vpop.f32.mrb[0].mxu1 }
 0x2a2   :  { %v1165_v2 = vadd.f32 %v968_v1, %v544_v61  ;;  %v767_v3 = vpop.f32.mrb[1].mxu1 }
 0x2a3   :  { %v1166_v5 = vadd.f32 %v767_v3, %v544_v61 }
 0x2a4   :  { %1202 = vtanh.f32 %v1165_v2 }
 0x2a5   :  { %1204 = vtanh.f32 %v1166_v5 }
 0x2ae   :  { %v1203_v13 = vpop.eup %1202 }
 0x2af   :  { %v1205_v14 = vpop.eup %1204  ;;  %v785_v17 = vmul.f32 %v1203_v13, %v682_v8 }
 0x2b0   :  { %v784_v20 = vmul.f32 %v1205_v14, %v681_v9 }
 0x2b1   :  { %v787_v21 = vadd.f32 %v785_v17, %v783_v15 }
 0x2b2   :  { %v786_v22 = vadd.f32 %v784_v20, %v782_v18 }
 0x2b3   :  { %789 = vst [vmem:[#allocation14 + $0x8] sm:$0xff] %v787_v21 }
 0x2b4   :  { %788 = vst [vmem:[#allocation14] sm:$0xff] %v786_v22 }
 0x2b5   :  { %1371 = shalt.err (!%p1368_p4)
}
 0x2b6   :  { %s1372_s11 = scalar_lea.hbm %s1611_s8, 256 }
 0x2b7   :  { %p1373_p5 = scmp.ne.s32.totalorder %s1611_s8, %s1372_s11  ;;  %p1376_p6 = scmp.lt.u32.totalorder %s1372_s11, %s1611_s8 }
 0x2b9   :  { %p1378_p7 = pnand %p1376_p6, %p1373_p5 }
 0x2bb   :  { %1381 = shalt.err (!%p1378_p7)
}
 0x2bc   :  { %801 = dma.vmem_to_hbm [thread:$0]  %s796_s26, 256, %s1611_s8, [#allocation4], %s1394_s17, %s1394_s17, %s1395_s18  }
 0x2bd   :  { %1390 = dma.done.wait [#allocation4], 256  }
 0x2be   :  { %1391 = vsyncadd [#allocation4], 4294967040 }
 0x2bf   :  { %805 = vsyncpa [#allocation3], 1 }
 0x2c0   :  { %806 = vsyncpa [#allocation6], 1 }
 0x2c1   :  { %807 = vsyncpa [#allocation9], 1 }
 0x2c2   :  { %808 = vsyncpa [#allocation12], 1 }
 0x2c3   :  { %809 = vsyncpa [#allocation4], 1 }

</bundles_post_ra>
